<compile_context>
chip_gen: v6e
topology: v6e:2x2x1
jax: 0.10.0
libtpu: 0.0.40
codegen_flags: <defaults>
</compile_context>

<pallas_src>
import jax
import jax.numpy as jnp
from jax.experimental import pallas as pl
from jax.experimental.pallas import tpu as pltpu


def _round_up(n, m):
    return ((n + m - 1) // m) * m


def _cdiv(a, b):
    return (a + b - 1) // b


# ----------------------------------------------------------------------------
# Fused kernel.
#   xp_ref : (BT, TP, K)   bf16/f32 flattened patches (K unpadded)
#   wf_ref : (K,  NC)      folded weight (W_patch@W_proj@W_cls)/P, lane-padded
#   b_ref  : (1,  NC)      classifier bias, lane-padded
#   out    : (BT, NC)      padded f32 logits (cols >= 18 are garbage/zero)
#   acc    : (BT, K)       f32 VMEM patch-sum accumulator over patch tiles
# Grid: (batch tiles [parallel], patch tiles [arbitrary / reduction]).
# ----------------------------------------------------------------------------
def _clip_fused_kernel(xp_ref, wf_ref, b_ref, out_ref, acc_ref):
    pj = pl.program_id(1)

    @pl.when(pj == 0)
    def _init():
        acc_ref[...] = jnp.zeros_like(acc_ref)

    # Streaming patch-sum for this (batch tile, patch tile): (BT, TP, K) -> (BT, K).
    acc_ref[...] += jnp.sum(xp_ref[...].astype(jnp.float32), axis=1)

    @pl.when(pj == pl.num_programs(1) - 1)
    def _finalize():
        # wf is pre-divided by the true patch count P, so acc @ wf is the
        # mean-pooled feature pushed through the folded linear head.
        out_ref[...] = (
            jnp.dot(acc_ref[...], wf_ref[...], preferred_element_type=jnp.float32)
            + b_ref[...]
        ).astype(out_ref.dtype)


def _pick_tiles(B, P, K, n_lanes, batch_tile, patch_tile, elem_bytes, vmem_budget):
    """Pick (BT, TP) as large as the input allows while keeping live VMEM bounded."""
    BT = max(8, min(_round_up(batch_tile, 8), _round_up(B, 8)))
    TP = max(16, min(_round_up(patch_tile, 16), _round_up(P, 16)))

    def live_bytes(bt, tp):
        xp_dbuf = 2 * bt * tp * K * elem_bytes          # double-buffered input
        wf = max(K, 8) * n_lanes * 4
        bias = 8 * n_lanes * 4
        acc = bt * _round_up(K, 128) * 4
        out = 2 * bt * n_lanes * 4
        return xp_dbuf + wf + bias + acc + out

    while live_bytes(BT, TP) > vmem_budget and (TP > 16 or BT > 8):
        if TP > 16:
            TP = max(16, (TP // 2) // 16 * 16)
        else:
            BT = max(8, (BT // 2) // 8 * 8)

    # Prefer >= 2 batch tiles so the "parallel" axis can occupy both v7x TCs.
    Bp = _round_up(B, 8)
    if Bp // BT < 2 and BT > 8:
        BT = max(8, _round_up(_cdiv(Bp, 2), 8))
    return BT, TP


def clip_model_forward(
    x,
    params,
    patch=4,
    batch_tile=128,
    patch_tile=256,
    act_dtype=jnp.bfloat16,
    vmem_budget_bytes=40 * 1024 * 1024,
):
    """ClipModel.forward: encode_image(x).float() -> Linear(dim, 18)."""
    B, C, H, W = x.shape
    p = patch
    Ph, Pw = H // p, W // p
    P = Ph * Pw
    K = C * p * p
    n_classes = params["w_cls"].shape[1]
    NC = _round_up(n_classes, 128)                  # lane-dense logits (18 -> 128)

    elem_bytes = jnp.dtype(act_dtype).itemsize
    BT, TP = _pick_tiles(B, P, K, NC, batch_tile, patch_tile, elem_bytes,
                         vmem_budget_bytes)
    Bp = _round_up(B, BT)
    Pp = _round_up(P, TP)

    # Patchify (== Conv2d(C, width, kernel=p, stride=p, bias=False) operand),
    # flatten order (C, dy, dx) matching PyTorch Conv2d weight layout.
    # Cast to act_dtype (bf16 default) so the dominant HBM read is half-width;
    # only B/P are padded (single jnp.pad), K stays unpadded in HBM.
    # TODO(synk): for large images, fold the patchify into the kernel via
    # strided index_maps on the raw NCHW input to avoid this wrapper copy.
    xp = x.reshape(B, C, Ph, p, Pw, p).transpose(0, 2, 4, 1, 3, 5).reshape(B, P, K)
    xp = xp.astype(act_dtype)
    if Bp != B or Pp != P:
        xp = jnp.pad(xp, ((0, Bp - B), (0, Pp - P), (0, 0)))

    # Fold all linear layers (mean over patches commutes with them) and the /P.
    w_fold = (params["w_patch"] @ params["w_proj"] @ params["w_cls"]) / P   # (K, 18)
    wf = jnp.zeros((K, NC), jnp.float32).at[:, :n_classes].set(
        w_fold.astype(jnp.float32))
    bias = jnp.zeros((1, NC), jnp.float32).at[:, :n_classes].set(
        params["b_cls"].reshape(1, n_classes).astype(jnp.float32))

    grid = (Bp // BT, Pp // TP)

    out_padded = pl.pallas_call(
        _clip_fused_kernel,
        out_shape=jax.ShapeDtypeStruct((Bp, NC), jnp.float32),
        grid_spec=pltpu.PrefetchScalarGridSpec(
            num_scalar_prefetch=0,
            grid=grid,
            in_specs=[
                pl.BlockSpec((BT, TP, K), lambda i, j: (i, j, 0)),   # K = full dim
                pl.BlockSpec((K, NC), lambda i, j: (0, 0)),
                pl.BlockSpec((1, NC), lambda i, j: (0, 0)),
            ],
            out_specs=pl.BlockSpec((BT, NC), lambda i, j: (i, 0)),
            scratch_shapes=[pltpu.VMEM((BT, K), jnp.float32)],
        ),
        compiler_params=pltpu.CompilerParams(
            dimension_semantics=("parallel", "arbitrary"),
            vmem_limit_bytes=48 * 1024 * 1024,
        ),
    )(xp, wf, bias)

    return out_padded[:B, :n_classes]               # (B, 18) float32 logits


def _reference_forward(x, params, patch=4):
    """Plain-JAX, unfused f32 reference for correctness checking."""
    B, C, H, W = x.shape
    p = patch
    Ph, Pw = H // p, W // p
    xp = x.reshape(B, C, Ph, p, Pw, p)
    xp = xp.transpose(0, 2, 4, 1, 3, 5).reshape(B * Ph * Pw, C * p * p)
    pe = xp @ params["w_patch"]
    pe = pe.reshape(B, Ph * Pw, -1)
    feat = jnp.mean(pe, axis=1).astype(jnp.float32)
    proj = feat @ params["w_proj"]
    return proj @ params["w_cls"] + params["b_cls"]


if __name__ == "__main__":
    # Small, forward-consistent shapes.
    B, C, H, W = 2, 3, 16, 16     # NCHW RGB image
    patch = 4                      # -> 4x4 = 16 patches, K = 48
    width = 32                     # visual stem width
    dim = 32                       # CLIP image embedding dim (Linear(dim, 18) input)
    n_classes = 18

    key = jax.random.PRNGKey(0)
    k1, k2, k3, k4, k5 = jax.random.split(key, 5)

    params = {
        "w_patch": 0.1 * jax.random.normal(k1, (C * patch * patch, width), jnp.float32),
        "w_proj":  0.1 * jax.random.normal(k2, (width, dim), jnp.float32),
        "w_cls":   0.1 * jax.random.normal(k3, (dim, n_classes), jnp.float32),
        "b_cls":   0.1 * jax.random.normal(k4, (1, n_classes), jnp.float32),
    }
    x = jax.random.normal(k5, (B, C, H, W), jnp.float32)

    ref = _reference_forward(x, params, patch=patch)

    # Default (bf16 activations in HBM) path: bandwidth-optimized.
    out_bf16 = jax.block_until_ready(clip_model_forward(x, params, patch=patch))
    assert out_bf16.shape == (B, n_classes) and out_bf16.dtype == jnp.float32
    assert jnp.allclose(out_bf16, ref, atol=2e-2, rtol=2e-2)

    # f32 activation path: tight-tolerance check of the kernel structure itself.
    out_f32 = jax.block_until_ready(
        clip_model_forward(x, params, patch=patch, act_dtype=jnp.float32))
    assert jnp.allclose(out_f32, ref, atol=1e-4, rtol=1e-4)

    print("KERNEL_OK")
</pallas_src>

<mosaic_0001>
module attributes {stable_mosaic.version = 11 : i64} {
  func.func @_clip_fused_kernel(%arg0: i32, %arg1: i32, %arg2: memref<8x16x48xbf16, #tpu.memory_space<vmem>>, %arg3: memref<48x128xf32, #tpu.memory_space<vmem>>, %arg4: memref<1x128xf32, #tpu.memory_space<vmem>>, %arg5: memref<8x128xf32, #tpu.memory_space<vmem>>, %arg6: memref<8x48xf32, #tpu.memory_space<vmem>>) attributes {dimension_semantics = [#tpu.dimension_semantics<parallel>, #tpu.dimension_semantics<arbitrary>], iteration_bounds = array<i64: 1, 1>, scalar_prefetch = 0 : i64, scratch_operands = 1 : i64, tpu.core_type = #tpu.core_type<tc>, window_params = [{transform_indices = @transform_0, window_bounds = array<i64: 8, 16, 48>}, {pipeline_mode = #tpu.pipeline_mode<synchronous>, transform_indices = @transform_1, window_bounds = array<i64: 48, 128>}, {pipeline_mode = #tpu.pipeline_mode<synchronous>, transform_indices = @transform_2, window_bounds = array<i64: 1, 128>}, {transform_indices = @transform_3, window_bounds = array<i64: 8, 128>}]} {
    %c0_i32 = arith.constant 0 : i32
    %0 = arith.cmpi eq, %arg1, %c0_i32 : i32
    %1 = arith.extui %0 : i1 to i32
    %c0_i32_0 = arith.constant 0 : i32
    %2 = arith.cmpi ne, %1, %c0_i32_0 : i32
    scf.if %2 {
      %cst_9 = arith.constant 0.000000e+00 : f32
      %12 = vector.broadcast %cst_9 : f32 to vector<8x48xf32>
      %c0_10 = arith.constant 0 : index
      %c0_11 = arith.constant 0 : index
      %13 = vector.load %arg6[%c0_10, %c0_11] : memref<8x48xf32, #tpu.memory_space<vmem>>, vector<8x48xf32>
      tpu.vector_store %arg6[%c0_10, %c0_11], %12 {strides = array<i32>} : memref<8x48xf32, #tpu.memory_space<vmem>>, vector<8x48xf32>,
    } else {
    }
    %c0 = arith.constant 0 : index
    %c0_1 = arith.constant 0 : index
    %3 = vector.load %arg6[%c0, %c0_1] : memref<8x48xf32, #tpu.memory_space<vmem>>, vector<8x48xf32>
    %c0_2 = arith.constant 0 : index
    %c0_3 = arith.constant 0 : index
    %c0_4 = arith.constant 0 : index
    %4 = vector.load %arg2[%c0_2, %c0_3, %c0_4] : memref<8x16x48xbf16, #tpu.memory_space<vmem>>, vector<8x16x48xbf16>
    %5 = arith.extf %4 : vector<8x16x48xbf16> to vector<8x16x48xf32>
    %cst = arith.constant dense<0.000000e+00> : vector<8x48xf32>
    %6 = vector.multi_reduction <add>, %5, %cst [1] : vector<8x16x48xf32> to vector<8x48xf32>
    %7 = arith.addf %3, %6 : vector<8x48xf32>
    %c0_5 = arith.constant 0 : index
    %c0_6 = arith.constant 0 : index
    %8 = vector.load %arg6[%c0_5, %c0_6] : memref<8x48xf32, #tpu.memory_space<vmem>>, vector<8x48xf32>
    tpu.vector_store %arg6[%c0_5, %c0_6], %7 {strides = array<i32>} : memref<8x48xf32, #tpu.memory_space<vmem>>, vector<8x48xf32>,
    %c0_i32_7 = arith.constant 0 : i32
    %9 = arith.cmpi eq, %arg1, %c0_i32_7 : i32
    %10 = arith.extui %9 : i1 to i32
    %c0_i32_8 = arith.constant 0 : i32
    %11 = arith.cmpi ne, %10, %c0_i32_8 : i32
    scf.if %11 {
      %c0_9 = arith.constant 0 : index
      %c0_10 = arith.constant 0 : index
      %12 = vector.load %arg6[%c0_9, %c0_10] : memref<8x48xf32, #tpu.memory_space<vmem>>, vector<8x48xf32>
      %c0_11 = arith.constant 0 : index
      %c0_12 = arith.constant 0 : index
      %13 = vector.load %arg3[%c0_11, %c0_12] : memref<48x128xf32, #tpu.memory_space<vmem>>, vector<48x128xf32>
      %cst_13 = arith.constant dense<0.000000e+00> : vector<8x128xf32>
      %14 = tpu.matmul %12, %13, %cst_13 {dimension_numbers = #tpu.dot_dimension_numbers<[1], [0], [0], [1], [0, 0, 1, 1], [], []>} : vector<8x48xf32>, vector<48x128xf32>, vector<8x128xf32> -> vector<8x128xf32>
      %c0_14 = arith.constant 0 : index
      %c0_15 = arith.constant 0 : index
      %15 = vector.load %arg4[%c0_14, %c0_15] : memref<1x128xf32, #tpu.memory_space<vmem>>, vector<1x128xf32>
      %16 = vector.broadcast %15 : vector<1x128xf32> to vector<8x128xf32>
      %17 = arith.addf %14, %16 : vector<8x128xf32>
      %c0_16 = arith.constant 0 : index
      %c0_17 = arith.constant 0 : index
      %18 = vector.load %arg5[%c0_16, %c0_17] : memref<8x128xf32, #tpu.memory_space<vmem>>, vector<8x128xf32>
      tpu.vector_store %arg5[%c0_16, %c0_17], %17 {strides = array<i32>} : memref<8x128xf32, #tpu.memory_space<vmem>>, vector<8x128xf32>,
    } else {
    }
    return
  }
  func.func @transform_0(%arg0: i32, %arg1: i32) -> (i32, i32, i32) {
    %c0_i32 = arith.constant 0 : i32
    %c0_i32_0 = arith.constant 0 : i32
    return %arg0, %arg1, %c0_i32 : i32, i32, i32
  }
  func.func @transform_1(%arg0: i32, %arg1: i32) -> (i32, i32) {
    %c0_i32 = arith.constant 0 : i32
    %c0_i32_0 = arith.constant 0 : i32
    %c0_i32_1 = arith.constant 0 : i32
    return %c0_i32, %c0_i32_0 : i32, i32
  }
  func.func @transform_2(%arg0: i32, %arg1: i32) -> (i32, i32) {
    %c0_i32 = arith.constant 0 : i32
    %c0_i32_0 = arith.constant 0 : i32
    %c0_i32_1 = arith.constant 0 : i32
    return %c0_i32, %c0_i32_0 : i32, i32
  }
  func.func @transform_3(%arg0: i32, %arg1: i32) -> (i32, i32) {
    %c0_i32 = arith.constant 0 : i32
    %c0_i32_0 = arith.constant 0 : i32
    return %arg0, %c0_i32 : i32, i32
  }
}

</mosaic_0001>

<bundles_post_ra>
// kernel: tpu_custom_call.1
= control target key start
LH: loop header
LB: loop body
LE: loop exit
PB: predicated region body
PF: predicated region fallthrough
CT: control target
= control target key end

     0   :  { %8 = vsyncpa [#allocation4], 0  ;;  %s492_s0 = inlined_call_operand.hbm [shape: bf16[8,16,48], index: 0, kind: input, shape index: {}]   ;;  %s493_s1 = inlined_call_operand.hbm [shape: f32[48,128], index: 1, kind: input, shape index: {}]   ;;  %s494_s2 = inlined_call_operand.vmem [shape: f32[1,128], index: 2, kind: input, shape index: {}]   ;;  %s495_s3 = inlined_call_operand.hbm [shape: f32[8,128], index: 3, kind: output, shape index: {}]  }
   0x1   :  { %9 = vsyncpa [#allocation7], 0 }
   0x2   :  { %10 = vsyncpa [#allocation5], 0  ;;  %s425_s12 = smov [#allocation3]  }
   0x3   :  { %s16_s13 = sshll.u32 %s425_s12, 4  ;;  %s17_s13 = int_to_ptr.vmem [resolvable:$true] %s16_s13 }
   0x4   :  { %s367_s14 = scalar_lea.vmem %s17_s13, 1024  ;;  %p372_p1 = scmp.lt.s32.totalorder %s17_s13, %s17_s13 }
   0x5   :  { %p368_p0 = scmp.ne.s32.totalorder %s17_s13, %s367_s14  ;;  %p373_p2 = scmp.lt.s32.totalorder %s367_s14, %s367_s14 }
   0x7   :  { %p374_p3 = por %p373_p2, %p372_p1 }
   0x9   :  { %p375_p4 = pnand %p374_p3, %p368_p0 }
   0xb   :  { %378 = shalt.err (!%p375_p4)
}
   0xc   :  { %s426_s15 = smov 64   ;;  %s427_s16 = smov 4  }
   0xd   :  { %22 = dma.hbm_to_vmem [thread:$0]  %s492_s0, 1024, %s17_s13, [#allocation4], %s426_s15, %s426_s15, %s427_s16  }
   0xe   :  { %s428_s19 = smov [#allocation6]  }
   0xf   :  { %s28_s20 = sshll.u32 %s428_s19, 4  ;;  %s29_s20 = int_to_ptr.vmem [resolvable:$true] %s28_s20 }
  0x10   :  { %s387_s21 = scalar_lea.vmem %s29_s20, 768  ;;  %p392_p6 = scmp.lt.s32.totalorder %s29_s20, %s29_s20 }
  0x11   :  { %p388_p5 = scmp.ne.s32.totalorder %s29_s20, %s387_s21  ;;  %p393_p7 = scmp.lt.s32.totalorder %s387_s21, %s387_s21 }
  0x13   :  { %p394_p8 = por %p393_p7, %p392_p6 }
  0x15   :  { %p395_p9 = pnand %p394_p8, %p388_p5 }
  0x17   :  { %398 = shalt.err (!%p395_p9)
}
  0x18   :  { %s429_s22 = smov 128   ;;  %s430_s23 = smov 8  }
  0x19   :  { %34 = dma.hbm_to_vmem [thread:$0]  %s493_s1, 768, %s29_s20, [#allocation7], %s429_s22, %s429_s22, %s430_s23  }
  0x1a   :  { %419 = dma.done.wait [#allocation4], 1024  }
  0x1b   :  { %420 = vsyncadd [#allocation4], 4294966272 }
  0x1c   :  { %421 = dma.done.wait [#allocation7], 768  }
  0x1d   :  { %422 = vsyncadd [#allocation7], 4294966528  ;;  %vm47_vm0 = vcmask 392192   ;;  %v431_v0 = vmov 0.0   ;;  %vm432_vm1 = vmmov 0   ;;  %v189_v1 = vld [vmem:[#allocation6 + $0x28] sm:$0xff] }
  0x1e   :  { %48 = vst.msk [vmem:[#allocation2] sm:$0xff] %vm47_vm0, %v431_v0  ;;  %335 = vmatprep.subr.mxu0 %v431_v0  ;;  %347 = vmatprep.mubr.msk.f32.mxu0 %vm432_vm1, %v431_v0  ;;  %v188_v2 = vld [vmem:[#allocation6 + $0x20] sm:$0xff]  ;;  %v187_v3 = vld [vmem:[#allocation6 + $0x18] sm:$0xff]  ;;  %v186_v4 = vld [vmem:[#allocation6 + $0x10] sm:$0xff]  ;;  %vm163_vm2 = vcmask 1041409   ;;  %vm165_vm3 = vcmask 1042434  }
  0x1f   :  { %336 = vmatpush3.msra.mxu0 %v189_v1  ;;  %v290_v5 = vld [vmem:[#allocation3] sm:$0xff]   ;;  %v321_v6 = vld [vmem:[#allocation3 + $0x8] sm:$0xff]   ;;  %v322_v11 = vld [vmem:[#allocation3 + $0x10] sm:$0xff]   ;;  %vm167_vm4 = vcmask 1043459   ;;  %vm169_vm5 = vcmask 1044484   ;;  %vm171_vm6 = vcmask 1045509  }
  0x20   :  { %337 = vmatprep.subr.mxu0 %v431_v0  ;;  %v291_v7 = vunpack.c.l.bf16 %v290_v5  ;;  %v292_v8 = vunpack.c.h.bf16 %v290_v5  ;;  %v295_v9 = vunpack.c.l.bf16 %v321_v6  ;;  %v296_v10 = vunpack.c.h.bf16 %v321_v6  ;;  %v323_v12 = vld [vmem:[#allocation3 + $0x18] sm:$0xff]   ;;  %v324_v13 = vld [vmem:[#allocation3 + $0x20] sm:$0xff]   ;;  %v325_v18 = vld [vmem:[#allocation3 + $0x28] sm:$0xff]   ;;  %s433_s26 = smov [#allocation8]  }
  0x21   :  { %338 = vmatpush3.msra.mxu0 %v188_v2  ;;  %v299_v14 = vunpack.c.l.bf16 %v322_v11  ;;  %v300_v15 = vunpack.c.h.bf16 %v322_v11  ;;  %v303_v16 = vunpack.c.l.bf16 %v323_v12  ;;  %v304_v17 = vunpack.c.h.bf16 %v323_v12  ;;  %v326_v19 = vld [vmem:[#allocation3 + $0x30] sm:$0xff]   ;;  %v461_v20 = vld [vmem:[#allocation3 + $0x38] sm:$0xff]   ;;  %v185_v25 = vld [vmem:[#allocation6 + $0x8] sm:$0xff]  ;;  %s277_s27 = sshll.u32 %s433_s26, 4  ;;  %s278_s27 = int_to_ptr.vmem [resolvable:$true] %s277_s27 }
  0x22   :  { %339 = vmatprep.subr.mxu0 %v431_v0  ;;  %v307_v21 = vunpack.c.l.bf16 %v324_v13  ;;  %v308_v22 = vunpack.c.h.bf16 %v324_v13  ;;  %v311_v23 = vunpack.c.l.bf16 %v325_v18  ;;  %v312_v24 = vunpack.c.h.bf16 %v325_v18  ;;  %v184_v34 = vld [vmem:[#allocation6] sm:$0xff]  ;;  %s399_s28 = scalar_lea.vmem %s278_s27, 128  ;;  %p404_p11 = scmp.lt.s32.totalorder %s278_s27, %s278_s27 }
  0x23   :  { %340 = vmatpush3.msra.mxu0 %v187_v3  ;;  %v315_v26 = vunpack.c.l.bf16 %v326_v19  ;;  %v316_v27 = vunpack.c.h.bf16 %v326_v19  ;;  %v319_v28 = vunpack.c.l.bf16 %v461_v20  ;;  %v320_v29 = vunpack.c.h.bf16 %v461_v20  ;;  %p400_p10 = scmp.ne.s32.totalorder %s278_s27, %s399_s28  ;;  %p405_p12 = scmp.lt.s32.totalorder %s399_s28, %s399_s28 }
  0x24   :  { %341 = vmatprep.subr.mxu0 %v431_v0  ;;  %v83_v30 = vsel %vm47_vm0, %v291_v7, 0.0  ;;  %v84_v31 = vsel %vm47_vm0, %v292_v8, 0.0  ;;  %v92_v32 = vsel %vm47_vm0, %v295_v9, 0.0  ;;  %v93_v33 = vsel %vm47_vm0, %v296_v10, 0.0 }
  0x25   :  { %342 = vmatpush3.msra.mxu0 %v186_v4  ;;  %v85_v35 = vadd.f32 %v84_v31, %v83_v30  ;;  %v94_v36 = vadd.f32 %v93_v33, %v92_v32  ;;  %v101_v37 = vsel %vm47_vm0, %v299_v14, 0.0  ;;  %v102_v38 = vsel %vm47_vm0, %v300_v15, 0.0  ;;  %p406_p13 = por %p405_p12, %p404_p11 }
  0x26   :  { %343 = vmatprep.subr.mxu0 %v431_v0  ;;  %v103_v39 = vadd.f32 %v102_v38, %v101_v37  ;;  %v110_v40 = vsel %vm47_vm0, %v303_v16, 0.0  ;;  %v111_v41 = vsel %vm47_vm0, %v304_v17, 0.0  ;;  %v119_v42 = vsel %vm47_vm0, %v307_v21, 0.0 }
  0x27   :  { %344 = vmatpush3.msra.mxu0 %v185_v25  ;;  %v86_v43 = vrot.slane %v85_v35, 4  ;;  %v95_v44 = vrot.slane %v94_v36, 4  ;;  %v112_v45 = vadd.f32 %v111_v41, %v110_v40  ;;  %v120_v46 = vsel %vm47_vm0, %v308_v22, 0.0  ;;  %p407_p0 = pnand %p406_p13, %p400_p10 }
  0x28   :  { %345 = vmatprep.subr.mxu0 %v431_v0  ;;  %v104_v47 = vrot.slane %v103_v39, 4  ;;  %v121_v48 = vadd.f32 %v120_v46, %v119_v42  ;;  %v128_v49 = vsel %vm47_vm0, %v311_v23, 0.0  ;;  %v129_v50 = vsel %vm47_vm0, %v312_v24, 0.0 }
  0x29   :  { %346 = vmatpush3.msra.mxu0 %v184_v34  ;;  %v87_v51 = vadd.f32 %v86_v43, %v85_v35  ;;  %v96_v52 = vadd.f32 %v95_v44, %v94_v36  ;;  %v113_v53 = vrot.slane %v112_v45, 4  ;;  %v130_v54 = vadd.f32 %v129_v50, %v128_v49  ;;  %v49_v44 = vld [vmem:[#allocation2] sm:$0xff] }
  0x2a   :  { %v105_v55 = vadd.f32 %v104_v47, %v103_v39  ;;  %v122_v56 = vrot.slane %v121_v48, 4  ;;  %v137_v57 = vsel %vm47_vm0, %v315_v26, 0.0  ;;  %v138_v58 = vsel %vm47_vm0, %v316_v27, 0.0  ;;  %v287_v49 = vld [vmem:[%s494_s2] ss:$0 sm:$0xff] }
  0x2b   :  { %v88_v59 = vrot.slane %v87_v51, 2  ;;  %v97_v60 = vrot.slane %v96_v52, 2  ;;  %v114_v61 = vadd.f32 %v113_v53, %v112_v45  ;;  %v131_v62 = vrot.slane %v130_v54, 4 }
  0x2c   :  { %v106_v63 = vrot.slane %v105_v55, 2  ;;  %v123_v0 = vadd.f32 %v122_v56, %v121_v48  ;;  %v139_v1 = vadd.f32 %v138_v58, %v137_v57  ;;  %v146_v2 = vsel %vm47_vm0, %v319_v28, 0.0 }
  0x2d   :  { %v89_v3 = vadd.f32 %v88_v59, %v87_v51  ;;  %v98_v4 = vadd.f32 %v97_v60, %v96_v52  ;;  %v115_v5 = vrot.slane %v114_v61, 2  ;;  %v132_v6 = vadd.f32 %v131_v62, %v130_v54 }
  0x2e   :  { %v107_v7 = vadd.f32 %v106_v63, %v105_v55  ;;  %v124_v8 = vrot.slane %v123_v0, 2  ;;  %v140_v9 = vrot.slane %v139_v1, 4  ;;  %v147_v10 = vsel %vm47_vm0, %v320_v29, 0.0 }
  0x2f   :  { %v90_v11 = vrot.slane %v89_v3, 1  ;;  %v99_v12 = vrot.slane %v98_v4, 1  ;;  %v116_v13 = vadd.f32 %v115_v5, %v114_v61  ;;  %v133_v14 = vrot.slane %v132_v6, 2 }
  0x30   :  { %v108_v15 = vrot.slane %v107_v7, 1  ;;  %v125_v16 = vadd.f32 %v124_v8, %v123_v0  ;;  %v141_v17 = vadd.f32 %v140_v9, %v139_v1  ;;  %v148_v18 = vadd.f32 %v147_v10, %v146_v2 }
  0x31   :  { %v91_v19 = vadd.f32 %v90_v11, %v89_v3  ;;  %v100_v20 = vadd.f32 %v99_v12, %v98_v4  ;;  %v117_v21 = vrot.slane %v116_v13, 1  ;;  %v134_v22 = vadd.f32 %v133_v14, %v132_v6 }
  0x32   :  { %v109_v23 = vadd.f32 %v108_v15, %v107_v7  ;;  %v126_v24 = vrot.slane %v125_v16, 1  ;;  %v142_v25 = vrot.slane %v141_v17, 2  ;;  %v149_v26 = vrot.slane %v148_v18, 4 }
  0x33   :  { %v118_v27 = vadd.f32 %v117_v21, %v116_v13  ;;  %v135_v28 = vrot.slane %v134_v22, 1  ;;  %v164_v29 = vsel %vm163_vm2, %v100_v20, %v91_v19  ;;  %vm173_vm7 = vcmask 1046534  }
  0x34   :  { %v127_v30 = vadd.f32 %v126_v24, %v125_v16  ;;  %v143_v31 = vadd.f32 %v142_v25, %v141_v17  ;;  %v150_v32 = vadd.f32 %v149_v26, %v148_v18  ;;  %v166_v33 = vsel %vm165_vm3, %v109_v23, %v164_v29 }
  0x35   :  { %v136_v34 = vadd.f32 %v135_v28, %v134_v22  ;;  %v168_v35 = vsel %vm167_vm4, %v118_v27, %v166_v33  ;;  %vm175_vm8 = vcmask 1047559  }
  0x36   :  { %v144_v36 = vrot.slane %v143_v31, 1  ;;  %v151_v37 = vrot.slane %v150_v32, 2  ;;  %v170_v38 = vsel %vm169_vm5, %v127_v30, %v168_v35 }
  0x37   :  { %v172_v41 = vsel %vm171_vm6, %v136_v34, %v170_v38 }
  0x38   :  { %v145_v39 = vadd.f32 %v144_v36, %v143_v31  ;;  %v152_v40 = vadd.f32 %v151_v37, %v150_v32 }
  0x3a   :  { %v153_v42 = vrot.slane %v152_v40, 1  ;;  %v174_v43 = vsel %vm173_vm7, %v145_v39, %v172_v41 }
  0x3c   :  { %v154_v45 = vadd.f32 %v153_v42, %v152_v40 }
  0x3e   :  { %v176_v46 = vsel %vm175_vm8, %v154_v45, %v174_v43 }
  0x3f   :  { %v178_v47 = vadd.f32 %v176_v46, %v49_v44 }
  0x41   :  { %179 = vst.msk [vmem:[#allocation2] sm:$0xff] %vm47_vm0, %v178_v47 }
  0x48   :  { %v183_v48 = vld [vmem:[#allocation2] sm:$0xff] }
  0x49   :  { %348 = vmatmul.mubr.msk.f32.vlgmr.msra.gmra.mxu0 %vm47_vm0, %v183_v48 }
 0x109   :  { %v266_v50 = vpop.f32.mrf.mxu0 }
 0x10a   :  { %v267_v51 = vadd.f32 %v287_v49, %v266_v50 }
 0x10b   :  { %v349_v52 = vpop.f32.mrf.mxu0 }
 0x10c   :  { %270 = vst [vmem:[#allocation8] sm:$0xff] %v267_v51 }
 0x10d   :  { %410 = shalt.err (!%p407_p0)
}
 0x10e   :  { %280 = dma.vmem_to_hbm [thread:$0]  %s278_s27, 128, %s495_s3, [#allocation5]  }
 0x10f   :  { %423 = dma.done.wait [#allocation5], 128  }
 0x110   :  { %424 = vsyncadd [#allocation5], 4294967168 }
 0x111   :  { %284 = vsyncpa [#allocation4], 1 }
 0x112   :  { %285 = vsyncpa [#allocation7], 1 }
 0x113   :  { %286 = vsyncpa [#allocation5], 1 }

</bundles_post_ra>
